<compile_context>
chip_gen: v5e
topology: v5e:2x2
jax: 0.10.0
libtpu: 0.0.40
codegen_flags: <defaults>
</compile_context>

<pallas_src>
import functools
import numpy as np
import jax
import jax.numpy as jnp
from jax import lax
from jax.experimental import pallas as pl
from jax.experimental.pallas import tpu as pltpu


# ----------------------------------------------------------------------------
# Pallas kernel: fused channel scatter + block-diagonal grouped-conv matmul.
# One grid step = (one batch element, one HW tile).
# ----------------------------------------------------------------------------
def deindexer_kernel(ind_ref, val_ref, w_ref, o_ref, *, c, m, k):
    # ind_ref / val_ref : (2*k*m, T) int32 / float32 -- pos rows then neg rows,
    #                     row index within each half = k_idx * m + m_idx,
    #                     indices are raw in [0, c) (slab offset is implicit).
    # w_ref             : (G*FK, c*m) block-diagonal grouped weight.
    # o_ref             : (G*FK, T) lane-dense output columns.
    T = ind_ref.shape[-1]
    KM = k * m
    ch = lax.broadcasted_iota(jnp.int32, (c, T), 0)      # per-slab channel iota

    slabs = []
    for mg in range(m):                                   # static, independent slabs
        # positive half: short last-write-wins chain (depth k, k is tiny)
        pos = jnp.zeros((c, T), jnp.float32)
        for kk in range(k):
            j = kk * m + mg
            hit = ch == ind_ref[j:j + 1, :]
            pos = jnp.where(hit, val_ref[j:j + 1, :], pos)
        # negative half: independent chain + "wrote here" mask
        neg = jnp.zeros((c, T), jnp.float32)
        neg_msk = jnp.zeros((c, T), jnp.bool_)
        for kk in range(k):
            j = KM + kk * m + mg
            hit = ch == ind_ref[j:j + 1, :]
            neg = jnp.where(hit, val_ref[j:j + 1, :], neg)
            neg_msk = jnp.logical_or(neg_msk, hit)
        # neg scatter is applied after pos in the reference module
        slabs.append(jnp.where(neg_msk, neg, pos))

    dense = jnp.concatenate(slabs, axis=0)                # (c*m, T), stays in vregs
    o_ref[...] = jnp.dot(w_ref[...], dense, preferred_element_type=jnp.float32)


# ----------------------------------------------------------------------------
# Wrapper: ConvDeIndexer.forward(code, quantize=False) in eval mode.
# ----------------------------------------------------------------------------
def conv_deindexer_pallas(ind_pos, val_pos, ind_neg, val_neg, weight,
                          *, c, m, stride, groups):
    """ind/val: (B, k, m, W, H); weight: (c*m, f//groups, kH, kW). -> (B, f, Ho, Wo)."""
    B, K, M, Wd, Hd = ind_pos.shape
    assert M == m
    cm = c * m
    Cin, cog, kH, kW = weight.shape
    assert Cin == cm
    G = groups
    cig = cm // G
    f = cog * G
    HW = Wd * Hd
    FK = cog * kH * kW
    GFK = G * FK
    n_entries = 2 * K * M

    # Sparse index/value streams with raw (un-offset) channel indices; the
    # c*m_index slab offset is handled implicitly inside the kernel.
    ind_all = jnp.concatenate(
        [ind_pos.astype(jnp.int32).reshape(B, K * M, HW),
         ind_neg.astype(jnp.int32).reshape(B, K * M, HW)], axis=1)      # (B, 2KM, HW)
    val_all = jnp.concatenate(
        [val_pos.reshape(B, K * M, HW), val_neg.reshape(B, K * M, HW)],
        axis=1).astype(jnp.float32)                                     # (B, 2KM, HW)

    # conv_transpose2d weight (c*m, f/G, kH, kW) -> one block-diagonal matmul
    # operand: rows [g*FK:(g+1)*FK) x cols [g*cig:(g+1)*cig) hold W_g (FK, cig).
    w_g = weight.reshape(G, cig, cog, kH, kW)
    w_g = jnp.transpose(w_g, (0, 2, 3, 4, 1)).reshape(G, FK, cig).astype(jnp.float32)
    w_bd = jnp.zeros((GFK, cm), jnp.float32)
    for g in range(G):
        w_bd = w_bd.at[g * FK:(g + 1) * FK, g * cig:(g + 1) * cig].set(w_g[g])

    # Fat lane-dense spatial tiles: largest divisor of HW that is a multiple of
    # 128 and <= 512 (keeps the rebuilt dense tensor comfortably in vregs while
    # amortizing per-step overhead and filling the 256-wide MXU), else full HW.
    if HW % 128 == 0:
        T = max(t for t in range(128, min(HW, 512) + 1, 128) if HW % t == 0)
    else:
        T = HW
    n_t = HW // T

    kernel = functools.partial(deindexer_kernel, c=c, m=M, k=K)
    out_cols = pl.pallas_call(
        kernel,
        out_shape=jax.ShapeDtypeStruct((B, GFK, HW), jnp.float32),
        grid=(B, n_t),
        in_specs=[
            pl.BlockSpec((pl.Squeezed(), n_entries, T), lambda b, t: (b, 0, t)),
            pl.BlockSpec((pl.Squeezed(), n_entries, T), lambda b, t: (b, 0, t)),
            pl.BlockSpec((GFK, cm), lambda b, t: (0, 0)),
        ],
        out_specs=pl.BlockSpec((pl.Squeezed(), GFK, T), lambda b, t: (b, 0, t)),
        compiler_params=pltpu.CompilerParams(
            dimension_semantics=("parallel", "parallel")),
    )(ind_all, val_all, w_bd)

    # --- col2im glue ---
    Ho = (Wd - 1) * stride + kH
    Wo = (Hd - 1) * stride + kW
    cols = out_cols.reshape(B, G, cog, kH, kW, Wd, Hd)
    if stride == kH and stride == kW:
        # No overlap: pure depth-to-space (single fused transpose/reshape).
        out = jnp.transpose(cols, (0, 1, 2, 5, 3, 6, 4)).reshape(B, f, Ho, Wo)
    else:
        out = jnp.zeros((B, f, Ho, Wo), jnp.float32)
        for dy in range(kH):
            for dx in range(kW):
                contrib = cols[:, :, :, dy, dx].reshape(B, f, Wd, Hd)
                out = out.at[:, :,
                             dy:dy + (Wd - 1) * stride + 1:stride,
                             dx:dx + (Hd - 1) * stride + 1:stride].add(contrib)
    # TODO(synk): training-time beta_pos/beta_neg running update and the
    # quantize=True branch (vals replaced by broadcast betas) are not modeled.
    return out


# ----------------------------------------------------------------------------
# Pure-JAX reference (scatter + lhs-dilated conv) for correctness checking.
# ----------------------------------------------------------------------------
def conv_deindexer_ref(ind_pos, val_pos, ind_neg, val_neg, weight,
                       *, c, m, stride, groups):
    B, K, M, Wd, Hd = ind_pos.shape
    cm = c * m
    off = (c * jnp.arange(M, dtype=jnp.int32)).reshape(1, 1, M, 1, 1)
    ip = (ind_pos.astype(jnp.int32) + off).reshape(B, K * M, Wd, Hd)
    ineg = (ind_neg.astype(jnp.int32) + off).reshape(B, K * M, Wd, Hd)
    vp = val_pos.reshape(B, K * M, Wd, Hd).astype(jnp.float32)
    vn = val_neg.reshape(B, K * M, Wd, Hd).astype(jnp.float32)

    bi = jnp.arange(B)[:, None, None, None]
    wi = jnp.arange(Wd)[None, None, :, None]
    hi = jnp.arange(Hd)[None, None, None, :]
    dense = jnp.zeros((B, cm, Wd, Hd), jnp.float32)
    dense = dense.at[bi, ip, wi, hi].set(vp)
    dense = dense.at[bi, ineg, wi, hi].set(vn)

    # conv_transpose2d(dense, weight, stride, groups) as an lhs-dilated conv
    # with a spatially-flipped, in/out-swapped kernel.
    Cin, cog, kH, kW = weight.shape
    G = groups
    cig = Cin // G
    f = cog * G
    wq = weight.reshape(G, cig, cog, kH, kW)
    wq = jnp.transpose(wq, (0, 2, 1, 3, 4))[:, :, :, ::-1, ::-1]
    wq = wq.reshape(f, cig, kH, kW)
    return lax.conv_general_dilated(
        dense, wq, window_strides=(1, 1),
        padding=((kH - 1, kH - 1), (kW - 1, kW - 1)),
        lhs_dilation=(stride, stride),
        dimension_numbers=("NCHW", "OIHW", "NCHW"),
        feature_group_count=G,
        precision=lax.Precision.HIGHEST)


if __name__ == "__main__":
    # Small shapes consistent with the module:
    # b=2, c=16, k=2, m=4 (c*m=64 dense channels), f=8, groups=2, stride=2,
    # proj kernel 2x2, spatial 16x16 -> output (2, 8, 32, 32).
    B, C, K, M, F_OUT, G, S, KH, KW, WD, HD = 2, 16, 2, 4, 8, 2, 2, 2, 2, 16, 16
    CM = C * M

    key = jax.random.PRNGKey(0)
    kidx, kvp, kvn, kw = jax.random.split(key, 4)

    # Distinct per-(b, m, position) channel indices: first K -> pos, next K -> neg
    # (matches a top-k indexer and avoids torch.scatter_'s undefined duplicate order).
    scores = jax.random.uniform(kidx, (B, M, WD, HD, C))
    order = jnp.argsort(scores, axis=-1).astype(jnp.int32)
    ind_pos = jnp.transpose(order[..., :K], (0, 4, 1, 2, 3))           # (B,K,M,W,H)
    ind_neg = jnp.transpose(order[..., K:2 * K], (0, 4, 1, 2, 3))
    val_pos = jnp.abs(jax.random.normal(kvp, (B, K, M, WD, HD), jnp.float32))
    val_neg = -jnp.abs(jax.random.normal(kvn, (B, K, M, WD, HD), jnp.float32))

    # conv_transpose2d weight from the indexer's proj: (c*m, f//groups, kH, kW)
    weight = 0.1 * jax.random.normal(kw, (CM, F_OUT // G, KH, KW), jnp.float32)

    out = conv_deindexer_pallas(ind_pos, val_pos, ind_neg, val_neg, weight,
                                c=C, m=M, stride=S, groups=G)
    out = jax.block_until_ready(out)

    ref = jax.block_until_ready(
        conv_deindexer_ref(ind_pos, val_pos, ind_neg, val_neg, weight,
                           c=C, m=M, stride=S, groups=G))

    assert out.shape == (B, F_OUT, (WD - 1) * S + KH, (HD - 1) * S + KW), out.shape
    np.testing.assert_allclose(np.asarray(out), np.asarray(ref),
                               rtol=1e-3, atol=1e-3)
    print("KERNEL_OK")
</pallas_src>

<mosaic_0001>
module attributes {stable_mosaic.version = 11 : i64} {
  func.func @deindexer_kernel(%arg0: i32, %arg1: i32, %arg2: memref<1x16x256xi32, #tpu.memory_space<vmem>>, %arg3: memref<1x16x256xf32, #tpu.memory_space<vmem>>, %arg4: memref<32x64xf32, #tpu.memory_space<vmem>>, %arg5: memref<1x32x256xf32, #tpu.memory_space<vmem>>) attributes {dimension_semantics = [#tpu.dimension_semantics<parallel>, #tpu.dimension_semantics<parallel>], iteration_bounds = array<i64: 2, 1>, scalar_prefetch = 0 : i64, scratch_operands = 0 : i64, tpu.core_type = #tpu.core_type<tc>, window_params = [{transform_indices = @transform_0, window_bounds = array<i64: 1, 16, 256>}, {transform_indices = @transform_1, window_bounds = array<i64: 1, 16, 256>}, {pipeline_mode = #tpu.pipeline_mode<synchronous>, transform_indices = @transform_2, window_bounds = array<i64: 32, 64>}, {transform_indices = @transform_3, window_bounds = array<i64: 1, 32, 256>}]} {
    %0 = tpu.iota {dimensions = array<i32: 0>} : vector<16x256xi32>
    %cst = arith.constant 0.000000e+00 : f32
    %1 = vector.broadcast %cst : f32 to vector<16x256xf32>
    %c0 = arith.constant 0 : index
    %c0_0 = arith.constant 0 : index
    %c0_1 = arith.constant 0 : index
    %2 = vector.load %arg2[%c0, %c0_0, %c0_1] : memref<1x16x256xi32, #tpu.memory_space<vmem>>, vector<1x1x256xi32>
    %3 = vector.shape_cast %2 : vector<1x1x256xi32> to vector<1x256xi32>
    %4 = vector.broadcast %3 : vector<1x256xi32> to vector<16x256xi32>
    %5 = arith.cmpi eq, %0, %4 : vector<16x256xi32>
    %c0_2 = arith.constant 0 : index
    %c0_3 = arith.constant 0 : index
    %c0_4 = arith.constant 0 : index
    %6 = vector.load %arg3[%c0_2, %c0_3, %c0_4] : memref<1x16x256xf32, #tpu.memory_space<vmem>>, vector<1x1x256xf32>
    %7 = vector.shape_cast %6 : vector<1x1x256xf32> to vector<1x256xf32>
    %8 = vector.shape_cast %7 : vector<1x256xf32> to vector<1x256xf32>
    %9 = vector.broadcast %8 : vector<1x256xf32> to vector<16x256xf32>
    %10 = arith.select %5, %9, %1 : vector<16x256xi1>, vector<16x256xf32>
    %c0_5 = arith.constant 0 : index
    %c4 = arith.constant 4 : index
    %c0_6 = arith.constant 0 : index
    %11 = vector.load %arg2[%c0_5, %c4, %c0_6] : memref<1x16x256xi32, #tpu.memory_space<vmem>>, vector<1x1x256xi32>
    %12 = vector.shape_cast %11 : vector<1x1x256xi32> to vector<1x256xi32>
    %13 = vector.broadcast %12 : vector<1x256xi32> to vector<16x256xi32>
    %14 = arith.cmpi eq, %0, %13 : vector<16x256xi32>
    %c0_7 = arith.constant 0 : index
    %c4_8 = arith.constant 4 : index
    %c0_9 = arith.constant 0 : index
    %15 = vector.load %arg3[%c0_7, %c4_8, %c0_9] : memref<1x16x256xf32, #tpu.memory_space<vmem>>, vector<1x1x256xf32>
    %16 = vector.shape_cast %15 : vector<1x1x256xf32> to vector<1x256xf32>
    %17 = vector.shape_cast %16 : vector<1x256xf32> to vector<1x256xf32>
    %18 = vector.broadcast %17 : vector<1x256xf32> to vector<16x256xf32>
    %19 = arith.select %14, %18, %10 : vector<16x256xi1>, vector<16x256xf32>
    %cst_10 = arith.constant 0.000000e+00 : f32
    %20 = vector.broadcast %cst_10 : f32 to vector<16x256xf32>
    %false = arith.constant false
    %21 = vector.broadcast %false : i1 to vector<16x256xi1>
    %c0_11 = arith.constant 0 : index
    %c8 = arith.constant 8 : index
    %c0_12 = arith.constant 0 : index
    %22 = vector.load %arg2[%c0_11, %c8, %c0_12] : memref<1x16x256xi32, #tpu.memory_space<vmem>>, vector<1x1x256xi32>
    %23 = vector.shape_cast %22 : vector<1x1x256xi32> to vector<1x256xi32>
    %24 = vector.broadcast %23 : vector<1x256xi32> to vector<16x256xi32>
    %25 = arith.cmpi eq, %0, %24 : vector<16x256xi32>
    %c0_13 = arith.constant 0 : index
    %c8_14 = arith.constant 8 : index
    %c0_15 = arith.constant 0 : index
    %26 = vector.load %arg3[%c0_13, %c8_14, %c0_15] : memref<1x16x256xf32, #tpu.memory_space<vmem>>, vector<1x1x256xf32>
    %27 = vector.shape_cast %26 : vector<1x1x256xf32> to vector<1x256xf32>
    %28 = vector.shape_cast %27 : vector<1x256xf32> to vector<1x256xf32>
    %29 = vector.broadcast %28 : vector<1x256xf32> to vector<16x256xf32>
    %30 = arith.select %25, %29, %20 : vector<16x256xi1>, vector<16x256xf32>
    %31 = arith.ori %21, %25 : vector<16x256xi1>
    %c0_16 = arith.constant 0 : index
    %c12 = arith.constant 12 : index
    %c0_17 = arith.constant 0 : index
    %32 = vector.load %arg2[%c0_16, %c12, %c0_17] : memref<1x16x256xi32, #tpu.memory_space<vmem>>, vector<1x1x256xi32>
    %33 = vector.shape_cast %32 : vector<1x1x256xi32> to vector<1x256xi32>
    %34 = vector.broadcast %33 : vector<1x256xi32> to vector<16x256xi32>
    %35 = arith.cmpi eq, %0, %34 : vector<16x256xi32>
    %c0_18 = arith.constant 0 : index
    %c12_19 = arith.constant 12 : index
    %c0_20 = arith.constant 0 : index
    %36 = vector.load %arg3[%c0_18, %c12_19, %c0_20] : memref<1x16x256xf32, #tpu.memory_space<vmem>>, vector<1x1x256xf32>
    %37 = vector.shape_cast %36 : vector<1x1x256xf32> to vector<1x256xf32>
    %38 = vector.shape_cast %37 : vector<1x256xf32> to vector<1x256xf32>
    %39 = vector.broadcast %38 : vector<1x256xf32> to vector<16x256xf32>
    %40 = arith.select %35, %39, %30 : vector<16x256xi1>, vector<16x256xf32>
    %41 = arith.ori %31, %35 : vector<16x256xi1>
    %42 = arith.select %41, %40, %19 : vector<16x256xi1>, vector<16x256xf32>
    %cst_21 = arith.constant 0.000000e+00 : f32
    %43 = vector.broadcast %cst_21 : f32 to vector<16x256xf32>
    %c0_22 = arith.constant 0 : index
    %c1 = arith.constant 1 : index
    %c0_23 = arith.constant 0 : index
    %44 = vector.load %arg2[%c0_22, %c1, %c0_23] : memref<1x16x256xi32, #tpu.memory_space<vmem>>, vector<1x1x256xi32>
    %45 = vector.shape_cast %44 : vector<1x1x256xi32> to vector<1x256xi32>
    %46 = vector.broadcast %45 : vector<1x256xi32> to vector<16x256xi32>
    %47 = arith.cmpi eq, %0, %46 : vector<16x256xi32>
    %c0_24 = arith.constant 0 : index
    %c1_25 = arith.constant 1 : index
    %c0_26 = arith.constant 0 : index
    %48 = vector.load %arg3[%c0_24, %c1_25, %c0_26] : memref<1x16x256xf32, #tpu.memory_space<vmem>>, vector<1x1x256xf32>
    %49 = vector.shape_cast %48 : vector<1x1x256xf32> to vector<1x256xf32>
    %50 = vector.shape_cast %49 : vector<1x256xf32> to vector<1x256xf32>
    %51 = vector.broadcast %50 : vector<1x256xf32> to vector<16x256xf32>
    %52 = arith.select %47, %51, %43 : vector<16x256xi1>, vector<16x256xf32>
    %c0_27 = arith.constant 0 : index
    %c5 = arith.constant 5 : index
    %c0_28 = arith.constant 0 : index
    %53 = vector.load %arg2[%c0_27, %c5, %c0_28] : memref<1x16x256xi32, #tpu.memory_space<vmem>>, vector<1x1x256xi32>
    %54 = vector.shape_cast %53 : vector<1x1x256xi32> to vector<1x256xi32>
    %55 = vector.broadcast %54 : vector<1x256xi32> to vector<16x256xi32>
    %56 = arith.cmpi eq, %0, %55 : vector<16x256xi32>
    %c0_29 = arith.constant 0 : index
    %c5_30 = arith.constant 5 : index
    %c0_31 = arith.constant 0 : index
    %57 = vector.load %arg3[%c0_29, %c5_30, %c0_31] : memref<1x16x256xf32, #tpu.memory_space<vmem>>, vector<1x1x256xf32>
    %58 = vector.shape_cast %57 : vector<1x1x256xf32> to vector<1x256xf32>
    %59 = vector.shape_cast %58 : vector<1x256xf32> to vector<1x256xf32>
    %60 = vector.broadcast %59 : vector<1x256xf32> to vector<16x256xf32>
    %61 = arith.select %56, %60, %52 : vector<16x256xi1>, vector<16x256xf32>
    %cst_32 = arith.constant 0.000000e+00 : f32
    %62 = vector.broadcast %cst_32 : f32 to vector<16x256xf32>
    %false_33 = arith.constant false
    %63 = vector.broadcast %false_33 : i1 to vector<16x256xi1>
    %c0_34 = arith.constant 0 : index
    %c9 = arith.constant 9 : index
    %c0_35 = arith.constant 0 : index
    %64 = vector.load %arg2[%c0_34, %c9, %c0_35] : memref<1x16x256xi32, #tpu.memory_space<vmem>>, vector<1x1x256xi32>
    %65 = vector.shape_cast %64 : vector<1x1x256xi32> to vector<1x256xi32>
    %66 = vector.broadcast %65 : vector<1x256xi32> to vector<16x256xi32>
    %67 = arith.cmpi eq, %0, %66 : vector<16x256xi32>
    %c0_36 = arith.constant 0 : index
    %c9_37 = arith.constant 9 : index
    %c0_38 = arith.constant 0 : index
    %68 = vector.load %arg3[%c0_36, %c9_37, %c0_38] : memref<1x16x256xf32, #tpu.memory_space<vmem>>, vector<1x1x256xf32>
    %69 = vector.shape_cast %68 : vector<1x1x256xf32> to vector<1x256xf32>
    %70 = vector.shape_cast %69 : vector<1x256xf32> to vector<1x256xf32>
    %71 = vector.broadcast %70 : vector<1x256xf32> to vector<16x256xf32>
    %72 = arith.select %67, %71, %62 : vector<16x256xi1>, vector<16x256xf32>
    %73 = arith.ori %63, %67 : vector<16x256xi1>
    %c0_39 = arith.constant 0 : index
    %c13 = arith.constant 13 : index
    %c0_40 = arith.constant 0 : index
    %74 = vector.load %arg2[%c0_39, %c13, %c0_40] : memref<1x16x256xi32, #tpu.memory_space<vmem>>, vector<1x1x256xi32>
    %75 = vector.shape_cast %74 : vector<1x1x256xi32> to vector<1x256xi32>
    %76 = vector.broadcast %75 : vector<1x256xi32> to vector<16x256xi32>
    %77 = arith.cmpi eq, %0, %76 : vector<16x256xi32>
    %c0_41 = arith.constant 0 : index
    %c13_42 = arith.constant 13 : index
    %c0_43 = arith.constant 0 : index
    %78 = vector.load %arg3[%c0_41, %c13_42, %c0_43] : memref<1x16x256xf32, #tpu.memory_space<vmem>>, vector<1x1x256xf32>
    %79 = vector.shape_cast %78 : vector<1x1x256xf32> to vector<1x256xf32>
    %80 = vector.shape_cast %79 : vector<1x256xf32> to vector<1x256xf32>
    %81 = vector.broadcast %80 : vector<1x256xf32> to vector<16x256xf32>
    %82 = arith.select %77, %81, %72 : vector<16x256xi1>, vector<16x256xf32>
    %83 = arith.ori %73, %77 : vector<16x256xi1>
    %84 = arith.select %83, %82, %61 : vector<16x256xi1>, vector<16x256xf32>
    %cst_44 = arith.constant 0.000000e+00 : f32
    %85 = vector.broadcast %cst_44 : f32 to vector<16x256xf32>
    %c0_45 = arith.constant 0 : index
    %c2 = arith.constant 2 : index
    %c0_46 = arith.constant 0 : index
    %86 = vector.load %arg2[%c0_45, %c2, %c0_46] : memref<1x16x256xi32, #tpu.memory_space<vmem>>, vector<1x1x256xi32>
    %87 = vector.shape_cast %86 : vector<1x1x256xi32> to vector<1x256xi32>
    %88 = vector.broadcast %87 : vector<1x256xi32> to vector<16x256xi32>
    %89 = arith.cmpi eq, %0, %88 : vector<16x256xi32>
    %c0_47 = arith.constant 0 : index
    %c2_48 = arith.constant 2 : index
    %c0_49 = arith.constant 0 : index
    %90 = vector.load %arg3[%c0_47, %c2_48, %c0_49] : memref<1x16x256xf32, #tpu.memory_space<vmem>>, vector<1x1x256xf32>
    %91 = vector.shape_cast %90 : vector<1x1x256xf32> to vector<1x256xf32>
    %92 = vector.shape_cast %91 : vector<1x256xf32> to vector<1x256xf32>
    %93 = vector.broadcast %92 : vector<1x256xf32> to vector<16x256xf32>
    %94 = arith.select %89, %93, %85 : vector<16x256xi1>, vector<16x256xf32>
    %c0_50 = arith.constant 0 : index
    %c6 = arith.constant 6 : index
    %c0_51 = arith.constant 0 : index
    %95 = vector.load %arg2[%c0_50, %c6, %c0_51] : memref<1x16x256xi32, #tpu.memory_space<vmem>>, vector<1x1x256xi32>
    %96 = vector.shape_cast %95 : vector<1x1x256xi32> to vector<1x256xi32>
    %97 = vector.broadcast %96 : vector<1x256xi32> to vector<16x256xi32>
    %98 = arith.cmpi eq, %0, %97 : vector<16x256xi32>
    %c0_52 = arith.constant 0 : index
    %c6_53 = arith.constant 6 : index
    %c0_54 = arith.constant 0 : index
    %99 = vector.load %arg3[%c0_52, %c6_53, %c0_54] : memref<1x16x256xf32, #tpu.memory_space<vmem>>, vector<1x1x256xf32>
    %100 = vector.shape_cast %99 : vector<1x1x256xf32> to vector<1x256xf32>
    %101 = vector.shape_cast %100 : vector<1x256xf32> to vector<1x256xf32>
    %102 = vector.broadcast %101 : vector<1x256xf32> to vector<16x256xf32>
    %103 = arith.select %98, %102, %94 : vector<16x256xi1>, vector<16x256xf32>
    %cst_55 = arith.constant 0.000000e+00 : f32
    %104 = vector.broadcast %cst_55 : f32 to vector<16x256xf32>
    %false_56 = arith.constant false
    %105 = vector.broadcast %false_56 : i1 to vector<16x256xi1>
    %c0_57 = arith.constant 0 : index
    %c10 = arith.constant 10 : index
    %c0_58 = arith.constant 0 : index
    %106 = vector.load %arg2[%c0_57, %c10, %c0_58] : memref<1x16x256xi32, #tpu.memory_space<vmem>>, vector<1x1x256xi32>
    %107 = vector.shape_cast %106 : vector<1x1x256xi32> to vector<1x256xi32>
    %108 = vector.broadcast %107 : vector<1x256xi32> to vector<16x256xi32>
    %109 = arith.cmpi eq, %0, %108 : vector<16x256xi32>
    %c0_59 = arith.constant 0 : index
    %c10_60 = arith.constant 10 : index
    %c0_61 = arith.constant 0 : index
    %110 = vector.load %arg3[%c0_59, %c10_60, %c0_61] : memref<1x16x256xf32, #tpu.memory_space<vmem>>, vector<1x1x256xf32>
    %111 = vector.shape_cast %110 : vector<1x1x256xf32> to vector<1x256xf32>
    %112 = vector.shape_cast %111 : vector<1x256xf32> to vector<1x256xf32>
    %113 = vector.broadcast %112 : vector<1x256xf32> to vector<16x256xf32>
    %114 = arith.select %109, %113, %104 : vector<16x256xi1>, vector<16x256xf32>
    %115 = arith.ori %105, %109 : vector<16x256xi1>
    %c0_62 = arith.constant 0 : index
    %c14 = arith.constant 14 : index
    %c0_63 = arith.constant 0 : index
    %116 = vector.load %arg2[%c0_62, %c14, %c0_63] : memref<1x16x256xi32, #tpu.memory_space<vmem>>, vector<1x1x256xi32>
    %117 = vector.shape_cast %116 : vector<1x1x256xi32> to vector<1x256xi32>
    %118 = vector.broadcast %117 : vector<1x256xi32> to vector<16x256xi32>
    %119 = arith.cmpi eq, %0, %118 : vector<16x256xi32>
    %c0_64 = arith.constant 0 : index
    %c14_65 = arith.constant 14 : index
    %c0_66 = arith.constant 0 : index
    %120 = vector.load %arg3[%c0_64, %c14_65, %c0_66] : memref<1x16x256xf32, #tpu.memory_space<vmem>>, vector<1x1x256xf32>
    %121 = vector.shape_cast %120 : vector<1x1x256xf32> to vector<1x256xf32>
    %122 = vector.shape_cast %121 : vector<1x256xf32> to vector<1x256xf32>
    %123 = vector.broadcast %122 : vector<1x256xf32> to vector<16x256xf32>
    %124 = arith.select %119, %123, %114 : vector<16x256xi1>, vector<16x256xf32>
    %125 = arith.ori %115, %119 : vector<16x256xi1>
    %126 = arith.select %125, %124, %103 : vector<16x256xi1>, vector<16x256xf32>
    %cst_67 = arith.constant 0.000000e+00 : f32
    %127 = vector.broadcast %cst_67 : f32 to vector<16x256xf32>
    %c0_68 = arith.constant 0 : index
    %c3 = arith.constant 3 : index
    %c0_69 = arith.constant 0 : index
    %128 = vector.load %arg2[%c0_68, %c3, %c0_69] : memref<1x16x256xi32, #tpu.memory_space<vmem>>, vector<1x1x256xi32>
    %129 = vector.shape_cast %128 : vector<1x1x256xi32> to vector<1x256xi32>
    %130 = vector.broadcast %129 : vector<1x256xi32> to vector<16x256xi32>
    %131 = arith.cmpi eq, %0, %130 : vector<16x256xi32>
    %c0_70 = arith.constant 0 : index
    %c3_71 = arith.constant 3 : index
    %c0_72 = arith.constant 0 : index
    %132 = vector.load %arg3[%c0_70, %c3_71, %c0_72] : memref<1x16x256xf32, #tpu.memory_space<vmem>>, vector<1x1x256xf32>
    %133 = vector.shape_cast %132 : vector<1x1x256xf32> to vector<1x256xf32>
    %134 = vector.shape_cast %133 : vector<1x256xf32> to vector<1x256xf32>
    %135 = vector.broadcast %134 : vector<1x256xf32> to vector<16x256xf32>
    %136 = arith.select %131, %135, %127 : vector<16x256xi1>, vector<16x256xf32>
    %c0_73 = arith.constant 0 : index
    %c7 = arith.constant 7 : index
    %c0_74 = arith.constant 0 : index
    %137 = vector.load %arg2[%c0_73, %c7, %c0_74] : memref<1x16x256xi32, #tpu.memory_space<vmem>>, vector<1x1x256xi32>
    %138 = vector.shape_cast %137 : vector<1x1x256xi32> to vector<1x256xi32>
    %139 = vector.broadcast %138 : vector<1x256xi32> to vector<16x256xi32>
    %140 = arith.cmpi eq, %0, %139 : vector<16x256xi32>
    %c0_75 = arith.constant 0 : index
    %c7_76 = arith.constant 7 : index
    %c0_77 = arith.constant 0 : index
    %141 = vector.load %arg3[%c0_75, %c7_76, %c0_77] : memref<1x16x256xf32, #tpu.memory_space<vmem>>, vector<1x1x256xf32>
    %142 = vector.shape_cast %141 : vector<1x1x256xf32> to vector<1x256xf32>
    %143 = vector.shape_cast %142 : vector<1x256xf32> to vector<1x256xf32>
    %144 = vector.broadcast %143 : vector<1x256xf32> to vector<16x256xf32>
    %145 = arith.select %140, %144, %136 : vector<16x256xi1>, vector<16x256xf32>
    %cst_78 = arith.constant 0.000000e+00 : f32
    %146 = vector.broadcast %cst_78 : f32 to vector<16x256xf32>
    %false_79 = arith.constant false
    %147 = vector.broadcast %false_79 : i1 to vector<16x256xi1>
    %c0_80 = arith.constant 0 : index
    %c11 = arith.constant 11 : index
    %c0_81 = arith.constant 0 : index
    %148 = vector.load %arg2[%c0_80, %c11, %c0_81] : memref<1x16x256xi32, #tpu.memory_space<vmem>>, vector<1x1x256xi32>
    %149 = vector.shape_cast %148 : vector<1x1x256xi32> to vector<1x256xi32>
    %150 = vector.broadcast %149 : vector<1x256xi32> to vector<16x256xi32>
    %151 = arith.cmpi eq, %0, %150 : vector<16x256xi32>
    %c0_82 = arith.constant 0 : index
    %c11_83 = arith.constant 11 : index
    %c0_84 = arith.constant 0 : index
    %152 = vector.load %arg3[%c0_82, %c11_83, %c0_84] : memref<1x16x256xf32, #tpu.memory_space<vmem>>, vector<1x1x256xf32>
    %153 = vector.shape_cast %152 : vector<1x1x256xf32> to vector<1x256xf32>
    %154 = vector.shape_cast %153 : vector<1x256xf32> to vector<1x256xf32>
    %155 = vector.broadcast %154 : vector<1x256xf32> to vector<16x256xf32>
    %156 = arith.select %151, %155, %146 : vector<16x256xi1>, vector<16x256xf32>
    %157 = arith.ori %147, %151 : vector<16x256xi1>
    %c0_85 = arith.constant 0 : index
    %c15 = arith.constant 15 : index
    %c0_86 = arith.constant 0 : index
    %158 = vector.load %arg2[%c0_85, %c15, %c0_86] : memref<1x16x256xi32, #tpu.memory_space<vmem>>, vector<1x1x256xi32>
    %159 = vector.shape_cast %158 : vector<1x1x256xi32> to vector<1x256xi32>
    %160 = vector.broadcast %159 : vector<1x256xi32> to vector<16x256xi32>
    %161 = arith.cmpi eq, %0, %160 : vector<16x256xi32>
    %c0_87 = arith.constant 0 : index
    %c15_88 = arith.constant 15 : index
    %c0_89 = arith.constant 0 : index
    %162 = vector.load %arg3[%c0_87, %c15_88, %c0_89] : memref<1x16x256xf32, #tpu.memory_space<vmem>>, vector<1x1x256xf32>
    %163 = vector.shape_cast %162 : vector<1x1x256xf32> to vector<1x256xf32>
    %164 = vector.shape_cast %163 : vector<1x256xf32> to vector<1x256xf32>
    %165 = vector.broadcast %164 : vector<1x256xf32> to vector<16x256xf32>
    %166 = arith.select %161, %165, %156 : vector<16x256xi1>, vector<16x256xf32>
    %167 = arith.ori %157, %161 : vector<16x256xi1>
    %168 = arith.select %167, %166, %145 : vector<16x256xi1>, vector<16x256xf32>
    %169 = tpu.concatenate %42, %84, %126, %168 in 0 : vector<16x256xf32>, vector<16x256xf32>, vector<16x256xf32>, vector<16x256xf32> -> vector<64x256xf32>
    %c0_90 = arith.constant 0 : index
    %c0_91 = arith.constant 0 : index
    %170 = vector.load %arg4[%c0_90, %c0_91] : memref<32x64xf32, #tpu.memory_space<vmem>>, vector<32x64xf32>
    %cst_92 = arith.constant dense<0.000000e+00> : vector<32x256xf32>
    %171 = tpu.matmul %170, %169, %cst_92 {dimension_numbers = #tpu.dot_dimension_numbers<[1], [0], [0], [1], [0, 0, 1, 1], [], []>} : vector<32x64xf32>, vector<64x256xf32>, vector<32x256xf32> -> vector<32x256xf32>
    %c0_93 = arith.constant 0 : index
    %c0_94 = arith.constant 0 : index
    %c0_95 = arith.constant 0 : index
    %172 = vector.load %arg5[%c0_93, %c0_94, %c0_95] : memref<1x32x256xf32, #tpu.memory_space<vmem>>, vector<1x32x256xf32>
    %173 = vector.shape_cast %172 : vector<1x32x256xf32> to vector<32x256xf32>
    %174 = vector.shape_cast %171 : vector<32x256xf32> to vector<1x32x256xf32>
    tpu.vector_store %arg5[%c0_93, %c0_94, %c0_95], %174 {strides = array<i32>} : memref<1x32x256xf32, #tpu.memory_space<vmem>>, vector<1x32x256xf32>,
    return
  }
  func.func @transform_0(%arg0: i32, %arg1: i32) -> (i32, i32, i32) {
    %c0_i32 = arith.constant 0 : i32
    %c0_i32_0 = arith.constant 0 : i32
    return %arg0, %c0_i32, %arg1 : i32, i32, i32
  }
  func.func @transform_1(%arg0: i32, %arg1: i32) -> (i32, i32, i32) {
    %c0_i32 = arith.constant 0 : i32
    %c0_i32_0 = arith.constant 0 : i32
    return %arg0, %c0_i32, %arg1 : i32, i32, i32
  }
  func.func @transform_2(%arg0: i32, %arg1: i32) -> (i32, i32) {
    %c0_i32 = arith.constant 0 : i32
    %c0_i32_0 = arith.constant 0 : i32
    %c0_i32_1 = arith.constant 0 : i32
    return %c0_i32, %c0_i32_0 : i32, i32
  }
  func.func @transform_3(%arg0: i32, %arg1: i32) -> (i32, i32, i32) {
    %c0_i32 = arith.constant 0 : i32
    %c0_i32_0 = arith.constant 0 : i32
    return %arg0, %c0_i32, %arg1 : i32, i32, i32
  }
}

</mosaic_0001>

<bundles_post_ra>
// kernel: tpu_custom_call.1
= control target key start
LH: loop header
LB: loop body
LE: loop exit
PB: predicated region body
PF: predicated region fallthrough
CT: control target
= control target key end

     0   :  { %s1681_s0 = inlined_call_operand.hbm [shape: s32[2,16,256], index: 0, kind: input, shape index: {}]   ;;  %s1682_s1 = inlined_call_operand.hbm [shape: f32[2,16,256], index: 1, kind: input, shape index: {}]   ;;  %s1683_s2 = inlined_call_operand.hbm [shape: f32[32,64], index: 2, kind: input, shape index: {}]   ;;  %s1684_s3 = inlined_call_operand.hbm [shape: f32[2,32,256], index: 3, kind: output, shape index: {}]  }
   0x1   :  { %1687 = sst [smem:[#allocation16_spill]] %s1683_s2 }
   0x2   :  { %8 = vsyncpa [#allocation3], 0 }
   0x3   :  { %10 = vsyncpa [#allocation3 + $0x1], 0 }
   0x4   :  { %11 = vsyncpa [#allocation6], 0 }
   0x5   :  { %13 = vsyncpa [#allocation6 + $0x1], 0 }
   0x6   :  { %14 = vsyncpa [#allocation4], 0 }
   0x7   :  { %16 = vsyncpa [#allocation4 + $0x1], 0  ;;  %s1205_s12 = smov 0   ;;  %s1207_s13 = smov 0  }
   0x8   :  { %s1209_s14 = smov 0   ;;  %s1211_s15 = smov 0  }
   0x9   :  { %s1213_s16 = smov 0   ;;  %s1215_s17 = smov 0  }
   0xa LB: > { %1688 = sst [smem:[#allocation13_spill]] %s1172_s16  ;;  %s1236_s18 = sadd.s32 4294967295, %s1176_s17   ;;  %s1176_s17 = sphi %s1215_s17, %s22_s17   ;;  %s1172_s16 = sphi %s1213_s16, %s1727_s16   ;;  %s1168_s15 = sphi %s1211_s15, %s1726_s15   ;;  %s1164_s14 = sphi %s1209_s14, %s1730_s14   ;;  %s1160_s13 = sphi %s1207_s13, %s1729_s13   ;;  %s1156_s12 = sphi %s1205_s12, %s1728_s12  }
   0xb   : > { %s835_s19 = sadd.s32 4294967294, %s1176_s17   ;;  %p56_p0 = scmp.ne.s32.totalorder %s1160_s13, %s1156_s12 }
   0xc   : > { %p57_p1 = scmp.eq.s32.totalorder %s1236_s18, 0  ;;  %p131_p2 = scmp.eq.s32.totalorder %s1236_s18, 1 }
   0xd   : > { %p137_p3 = scmp.eq.s32.totalorder %s835_s19, 1  ;;  %p836_p5 = scmp.ge.s32.totalorder %s1176_s17, 1 }
   0xe   : > { %p1245_p4 = por %p57_p1, %p56_p0  ;;  %p144_p7 = scmp.lt.s32.totalorder %s1176_s17, 3 }
   0xf   : > { %p1250_p6 = por %p137_p3, %p56_p0  ;;  %s1691_s2 = sld [smem:[#allocation16_spill]] }
  0x10   : > { %p1258_p8 = pnand %p836_p5, %p144_p7  ;;  %s1178_s26 = smov [#allocation7]  }
  0x11   : > { %s157_s27 = sshll.u32 %s1178_s26, 4  ;;  %p838_p11 = scmp.ge.s32.totalorder %s1176_s17, 2  ;;  %s158_s27 = int_to_ptr.vmem [resolvable:$true] %s157_s27 }
  0x12   : > { %p922_p9 = pneg %p1258_p8  ;;  %s1179_s28 = smov 128  }
  0x13   : > { %s1180_s29 = smov 8   ;;  %s34_s30 = sadd.s32 1, %s1172_s16 }
  0x14   : > { %p923_p10 = pnand %p922_p9, %p57_p1  ;;  %p36_p12 = scmp.ge.s32.totalorder %s34_s30, 2 }
  0x15   : > { %s155_s24 = sshll.u32 %s1691_s2, 4  ;;  %s43_s4 = sadd.s32 1, %s1164_s14  ;;  %s156_s24 = int_to_ptr.hbm [resolvable:$true] %s155_s24 }
  0x16   : > { %925 = dma.hbm_to_vmem [thread:$0]  (!%p923_p10), %s156_s24, 512, %s158_s27, [#allocation6], %s1179_s28, %s1179_s28, %s1180_s29  }
  0x17   : > { %p50_p13 = scmp.ne.s32.totalorder %s1164_s14, %s1160_s13  ;;  %p51_p0 = scmp.eq.s32.totalorder %s1176_s17, 0 }
  0x18   : > { %s1732_s30 = smov (%p36_p12, %s34_s30), 0  ;;  %p938_p7 = scmp.lt.s32.totalorder %s1176_s17, 2 }
  0x19   : > { %1693 = sst [smem:[#allocation14_spill]] %s1732_s30  ;;  %p1274_p3 = por %p51_p0, %p50_p13 }
  0x1a   : > { %p1280_p5 = por %p131_p2, %p50_p13  ;;  %s38_s7 = ssub.s32 %s1172_s16, %s1732_s30 }
  0x1b   : > { %p41_p9 = scmp.eq.s32.totalorder %s38_s7, 0  ;;  %s171_s8 = sand.u32 1, %s1164_s14  }
  0x1c   : > { %s839_s9 = sshll.u32 %s171_s8, 5  ;;  %s893_s11 = sshll.u32 %s1172_s16, 5 }
  0x1d   : > { %s1289_s10 = scalar_select %p41_p9, %s1164_s14, %s43_s4  }
  0x1e   : > { %s182_s23 = scalar_lea.hbm %s1681_s0, %s893_s11  ;;  %s175_s24 = scalar_lea.vmem [#allocation2], %s839_s9 }
  0x1f   : > { %1696 = sst [smem:[#allocation15_spill]] %s1289_s10  ;;  %s185_s26 = sshll.u32 %s175_s24, 4  ;;  %s186_s26 = int_to_ptr.vmem [resolvable:$true] %s185_s26 }
  0x20   : > { %s183_s27 = sshll.u32 %s182_s23, 4  ;;  %p927_p2 = pnand %p938_p7, %p1274_p3  ;;  %s184_s27 = int_to_ptr.hbm [resolvable:$true] %s183_s27 }
  0x21   : > { %s172_s28 = scalar_lea.sflag [#allocation3], %s171_s8  ;;  %s1181_s29 = smov 256  }
  0x22   : > { %s1182_s7 = smov 16   ;;  %s206_s30 = scalar_lea.hbm %s1682_s1, %s893_s11 }
  0x23   : > { %929 = dma.hbm_to_vmem [thread:$0]  (!%p927_p2), %s184_s27, 512, %s186_s26, %s172_s28, %s1181_s29, %s1181_s29, %s1182_s7  }
  0x24   : > { %s199_s16 = scalar_lea.vmem [#allocation5], %s839_s9  ;;  %s207_s19 = sshll.u32 %s206_s30, 4  ;;  %s208_s19 = int_to_ptr.hbm [resolvable:$true] %s207_s19 }
  0x25   : > { %s209_s10 = sshll.u32 %s199_s16, 4  ;;  %s195_s22 = sand.u32 1, %s1176_s17   ;;  %s210_s10 = int_to_ptr.vmem [resolvable:$true] %s209_s10 }
  0x26   : > { %s196_s24 = scalar_lea.sflag [#allocation6], %s195_s22  ;;  %221 = sbr.rel (%p1258_p8) target bundleno = 251 (0xfb), region = 32 }
  0x27   : > { %932 = dma.hbm_to_vmem [thread:$0]  (!%p927_p2), %s208_s19, 512, %s210_s10, %s196_s24, %s1181_s29, %s1181_s29, %s1182_s7  }
  0x28   : > { %s1304_s5 = sand.u32 (!%p1258_p8), 1, %s1160_s13  }
  0x29   : > { %s846_s8 = sshll.u32 (!%p1258_p8), %s1304_s5, 5  ;;  %s224_s2 = scalar_lea.sflag (!%p1258_p8), [#allocation3], %s1304_s5 }
  0x2a   : > { %s1308_s11 = scalar_lea.vmem (!%p1258_p8), [#allocation2], %s846_s8 }
  0x2b   : > { %1139 = dma.done.wait (%p1245_p4), %s224_s2, 512  }
  0x2c   : > { %1141 = vsyncadd (%p1245_p4), %s224_s2, 4294966784  ;;  %s233_s16 = sand.u32 1, %s1236_s18   ;;  %s1315_s30 = scalar_lea.vmem [#allocation5], %s846_s8 }
  0x2d   : > { %s234_s25 = scalar_lea.sflag [#allocation6], %s233_s16 }
  0x2e   : > { %1143 = dma.done.wait (%p1245_p4), %s234_s25, 512  }
  0x2f   : > { %1145 = vsyncadd (%p1245_p4), %s234_s25, 4294966784 }
  0x30   : > { %1147 = dma.done.wait (%p57_p1), [#allocation6], 512  }
  0x31   : > { %1149 = vsyncadd (%p57_p1), [#allocation6], 4294966784  ;;  %v274_v0 = vlaneseq  ;;  %v872_v3 = vld [vmem:[%s1308_s11 + $0x3] ss:$8 sm:$0x3]  ;;  %s849_s18 = sshll.u32 %s1304_s5, 6 }
  0x32   : > { %v1332_v4 = vld [vmem:[%s1315_s30 + $0x3] ss:$8 sm:$0x3]  ;;  %v529_v5 = vperm.slane %v872_v3, 0  ;;  %v530_v8 = vperm.slane %v872_v3, 1  ;;  %s270_s20 = scalar_lea.vmem [#allocation8], %s849_s18 }
  0x33   : > { %v1325_v1 = vshrl.u32 %v274_v0, 7  ;;  %v538_v6 = vperm.slane %v1332_v4, 0  ;;  %v874_v7 = vld [vmem:[%s1308_s11 + $0x7] ss:$8 sm:$0x3]  ;;  %v539_v11 = vperm.slane %v1332_v4, 1 }
  0x34   : > { %v548_v9 = vperm.slane %v874_v7, 0  ;;  %v1337_v10 = vld [vmem:[%s1315_s30 + $0x7] ss:$8 sm:$0x3]  ;;  %v549_v12 = vperm.slane %v874_v7, 1  ;;  %s895_s9 = sshll.u32 %s1168_s15, 6 }
  0x35   : > { %v1328_v2 = vadd.s32 8, %v1325_v1  ;;  %v557_v13 = vperm.slane %v1337_v10, 0  ;;  %v876_v14 = vld [vmem:[%s1308_s11 + $0x13] ss:$8 sm:$0x3]  ;;  %v558_v15 = vperm.slane %v1337_v10, 1  ;;  %vm531_vm7 = vcmp.eq.s32.totalorder %v1325_v1, %v529_v5  ;;  %s708_s26 = scalar_lea.hbm %s1684_s3, %s895_s9 }
  0x36   : > { %v567_v17 = vperm.slane %v876_v14, 0  ;;  %v877_v18 = vld [vmem:[%s1315_s30 + $0x13] ss:$8 sm:$0x3]  ;;  %v568_v23 = vperm.slane %v876_v14, 1  ;;  %v542_v36 = vsel %vm531_vm7, %v538_v6, 0.0  ;;  %vm550_vm10 = vcmp.eq.s32.totalorder %v1325_v1, %v548_v9 }
  0x37   : > { %vm533_vm0 = vcmp.eq.s32.totalorder %v1328_v2, %v529_v5  ;;  %vm534_vm1 = vcmp.eq.s32.totalorder %v1328_v2, %v530_v8  ;;  %vm552_vm2 = vcmp.eq.s32.totalorder %v1328_v2, %v548_v9  ;;  %v576_v21 = vperm.slane %v877_v18, 0  ;;  %v878_v22 = vld [vmem:[%s1308_s11 + $0x17] ss:$8 sm:$0x3]  ;;  %s709_s27 = sshll.u32 %s270_s20, 4  ;;  %s711_s28 = sshll.u32 %s708_s26, 4  ;;  %s710_s27 = int_to_ptr.vmem [resolvable:$true] %s709_s27  ;;  %s712_s28 = int_to_ptr.hbm [resolvable:$true] %s711_s28 }
  0x38   : > { %v544_v16 = vsel %vm533_vm0, %v538_v6, 0.0  ;;  %v545_v19 = vsel %vm534_vm1, %v539_v11, 0.0  ;;  %vm553_vm3 = vcmp.eq.s32.totalorder %v1328_v2, %v549_v12  ;;  %vm1350_vm4 = vcmp.eq.s32.totalorder %v1328_v2, %v567_v17  ;;  %v879_v26 = vld [vmem:[%s1315_s30 + $0x17] ss:$8 sm:$0x3]  ;;  %s695_s15 = scalar_lea.sflag [#allocation4], %s1304_s5 }
  0x39   : > { %v563_v20 = vsel %vm552_vm2, %v557_v13, %v544_v16  ;;  %v586_v25 = vperm.slane %v878_v22, 0  ;;  %v564_v27 = vsel %vm553_vm3, %v558_v15, %v545_v19  ;;  %v577_v28 = vperm.slane %v877_v18, 1  ;;  %v1371_v37 = vld [vmem:[%s1308_s11 + $0x2] ss:$8 sm:$0x3]  ;;  %s1100_s29 = sshra.s32 %s712_s28, 4  ;;  %s1101_s29 = int_to_ptr.hbm [resolvable:$true] %s1100_s29 }
  0x3a   : > { %v582_v29 = vsel %vm1350_vm4, %v576_v21, 0.0  ;;  %v595_v30 = vperm.slane %v879_v26, 0  ;;  %vm1358_vm5 = vcmp.eq.s32.totalorder %v1328_v2, %v568_v23  ;;  %v587_v32 = vperm.slane %v878_v22, 1  ;;  %v1374_v38 = vld [vmem:[%s1315_s30 + $0x2] ss:$8 sm:$0x3]  ;;  %p1107_p10 = scmp.lt.s32.totalorder %s1101_s29, %s1684_s3 }
  0x3b   : > { %vm590_vm6 = vcmp.eq.s32.totalorder %v1328_v2, %v586_v25  ;;  %v583_v33 = vsel %vm1358_vm5, %v577_v28, 0.0  ;;  %v596_v34 = vperm.slane %v879_v26, 1  ;;  %v1377_v39 = vld [vmem:[%s1308_s11 + $0x6] ss:$8 sm:$0x3]  ;;  %v561_v42 = vsel %vm550_vm10, %v557_v13, %v542_v36  ;;  %s1102_s7 = scalar_lea.hbm %s1101_s29, 64 }
  0x3c   : > { %v601_v35 = vsel %vm590_vm6, %v595_v30, %v582_v29  ;;  %vm605_vm8 = vmor %vm1350_vm4, %vm590_vm6  ;;  %vm591_vm9 = vcmp.eq.s32.totalorder %v1328_v2, %v587_v32  ;;  %vm1382_vm12 = vcmp.eq.s32.totalorder %v1325_v1, %v567_v17  ;;  %v1387_v44 = vld [vmem:[%s1315_s30 + $0x6] ss:$8 sm:$0x3]  ;;  %v1390_v45 = vld [vmem:[%s1308_s11 + $0x12] ss:$8 sm:$0x3]  ;;  %vm588_vm13 = vcmp.eq.s32.totalorder %v1325_v1, %v586_v25  ;;  %p1103_p1 = scmp.ne.s32.totalorder %s1101_s29, %s1102_s7 }
  0x3d   : > { %v609_v40 = vsel %vm605_vm8, %v601_v35, %v563_v20  ;;  %v602_v41 = vsel %vm591_vm9, %v596_v34, %v583_v33  ;;  %vm606_vm11 = vmor %vm1358_vm5, %vm591_vm9  ;;  %v580_v47 = vsel %vm1382_vm12, %v576_v21, 0.0  ;;  %vm532_vm14 = vcmp.eq.s32.totalorder %v1325_v1, %v530_v8  ;;  %v1397_v48 = vld [vmem:[%s1315_s30 + $0x12] ss:$8 sm:$0x3]  ;;  %s1106_s22 = scalar_lea.hbm %s1684_s3, 128 }
  0x3e   : > { %896 = vmatpush.msra.mxu2 %v609_v40  ;;  %v610_v46 = vsel %vm606_vm11, %v602_v41, %v564_v27  ;;  %636 = vmatpush.msra.mxu0 %v609_v40  ;;  %v599_v49 = vsel %vm588_vm13, %v595_v30, %v580_v47  ;;  %vm603_vm15 = vmor %vm1382_vm12, %vm588_vm13  ;;  %v543_v50 = vsel %vm532_vm14, %v539_v11, 0.0  ;;  %vm551_vm0 = vcmp.eq.s32.totalorder %v1325_v1, %v549_v12  ;;  %v1408_v52 = vld [vmem:[%s1308_s11 + $0x16] ss:$8 sm:$0x3]  ;;  %p1104_p4 = pnand %p1103_p1, %p1280_p5  ;;  %p1108_p12 = scmp.lt.s32.totalorder %s1106_s22, %s1102_s7 }
  0x3f   : > { %904 = vmatpush.msra.mxu3 %v610_v46  ;;  %vm1403_vm1 = vcmp.eq.s32.totalorder %v1325_v1, %v568_v23  ;;  %665 = vmatpush.msra.mxu1 %v610_v46  ;;  %v607_v53 = vsel %vm603_vm15, %v599_v49, %v561_v42  ;;  %v562_v54 = vsel %vm551_vm0, %v558_v15, %v543_v50  ;;  %v1414_v56 = vld [vmem:[%s1315_s30 + $0x16] ss:$8 sm:$0x3]  ;;  %v445_v58 = vperm.slane %v1371_v37, 0 }
  0x40   : > { %v581_v55 = vsel %vm1403_vm1, %v577_v28, 0.0  ;;  %vm589_vm2 = vcmp.eq.s32.totalorder %v1325_v1, %v587_v32  ;;  %897 = vmatpush.msra.mxu2 %v607_v53  ;;  %v454_v59 = vperm.slane %v1374_v38, 0  ;;  %v464_v60 = vperm.slane %v1377_v39, 0  ;;  %637 = vmatpush.msra.mxu0 %v607_v53  ;;  %v1455_v23 = vld [vmem:[%s1308_s11 + $0x1] ss:$8 sm:$0x3]  ;;  %p1105_p8 = pneg %p1104_p4  ;;  %p1109_p13 = por %p1108_p12, %p1107_p10 }
  0x41   : > { %v600_v57 = vsel %vm589_vm2, %v596_v34, %v581_v55  ;;  %vm604_vm3 = vmor %vm1403_vm1, %vm589_vm2  ;;  %v473_v62 = vperm.slane %v1387_v44, 0  ;;  %v483_v63 = vperm.slane %v1390_v45, 0  ;;  %v492_v0 = vperm.slane %v1397_v48, 0  ;;  %v1458_v24 = vld [vmem:[%s1315_s30 + $0x1] ss:$8 sm:$0x3] }
  0x42   : > { %v608_v61 = vsel %vm604_vm3, %v600_v57, %v562_v54  ;;  %vm449_vm4 = vcmp.eq.s32.totalorder %v1328_v2, %v445_v58  ;;  %vm468_vm5 = vcmp.eq.s32.totalorder %v1328_v2, %v464_v60  ;;  %v502_v3 = vperm.slane %v1408_v52, 0  ;;  %v1461_v25 = vld [vmem:[%s1308_s11 + $0x5] ss:$8 sm:$0x3]  ;;  %p1110_p0 = pnand %p1109_p13, %p1105_p8 }
  0x43   : > { %905 = vmatpush.msra.mxu3 %v608_v61  ;;  %v511_v4 = vperm.slane %v1414_v56, 0  ;;  %666 = vmatpush.msra.mxu1 %v608_v61  ;;  %v460_v5 = vsel %vm449_vm4, %v454_v59, 0.0  ;;  %vm487_vm6 = vcmp.eq.s32.totalorder %v1328_v2, %v483_v63  ;;  %v446_v6 = vperm.slane %v1371_v37, 1  ;;  %v1472_v29 = vld [vmem:[%s1315_s30 + $0x5] ss:$8 sm:$0x3] }
  0x44   : > { %v455_v7 = vperm.slane %v1374_v38, 1  ;;  %v479_v8 = vsel %vm468_vm5, %v473_v62, %v460_v5  ;;  %v498_v9 = vsel %vm487_vm6, %v492_v0, 0.0  ;;  %vm506_vm7 = vcmp.eq.s32.totalorder %v1328_v2, %v502_v3  ;;  %v1480_v33 = vld [vmem:[%s1308_s11 + $0x11] ss:$8 sm:$0x3] }
  0x45   : > { %v465_v10 = vperm.slane %v1377_v39, 1  ;;  %v517_v11 = vsel %vm506_vm7, %v511_v4, %v498_v9  ;;  %vm521_vm8 = vmor %vm487_vm6, %vm506_vm7  ;;  %vm450_vm9 = vcmp.eq.s32.totalorder %v1328_v2, %v446_v6  ;;  %v474_v12 = vperm.slane %v1387_v44, 1  ;;  %v1483_v34 = vld [vmem:[%s1315_s30 + $0x11] ss:$8 sm:$0x3] }
  0x46   : > { %v484_v13 = vperm.slane %v1390_v45, 1  ;;  %v525_v14 = vsel %vm521_vm8, %v517_v11, %v479_v8  ;;  %v461_v15 = vsel %vm450_vm9, %v455_v7, 0.0  ;;  %v493_v16 = vperm.slane %v1397_v48, 1  ;;  %v1496_v38 = vld [vmem:[%s1308_s11 + $0x15] ss:$8 sm:$0x3] }
  0x47   : > { %vm469_vm10 = vcmp.eq.s32.totalorder %v1328_v2, %v465_v10  ;;  %898 = vmatpush.msra.mxu2 %v525_v14  ;;  %v503_v19 = vperm.slane %v1408_v52, 1  ;;  %v512_v20 = vperm.slane %v1414_v56, 1  ;;  %638 = vmatpush.msra.mxu0 %v525_v14  ;;  %vm447_vm12 = vcmp.eq.s32.totalorder %v1325_v1, %v445_v58  ;;  %v1502_v42 = vld [vmem:[%s1315_s30 + $0x15] ss:$8 sm:$0x3] }
  0x48   : > { %v480_v17 = vsel %vm469_vm10, %v474_v12, %v461_v15  ;;  %vm1439_vm11 = vcmp.eq.s32.totalorder %v1328_v2, %v484_v13  ;;  %vm466_vm13 = vcmp.eq.s32.totalorder %v1325_v1, %v464_v60  ;;  %vm1450_vm14 = vcmp.eq.s32.totalorder %v1325_v1, %v483_v63  ;;  %v1543_v9 = vld [vmem:[%s1308_s11] ss:$8 sm:$0x3]  ;;  %v1549_v11 = vld [vmem:[%s1308_s11 + $0x4] ss:$8 sm:$0x3] }
  0x49   : > { %v499_v21 = vsel %vm1439_vm11, %v493_v16, 0.0  ;;  %vm507_vm15 = vcmp.eq.s32.totalorder %v1328_v2, %v503_v19  ;;  %v458_v26 = vsel %vm447_vm12, %v454_v59, 0.0  ;;  %v496_v27 = vsel %vm1450_vm14, %v492_v0, 0.0  ;;  %v1560_v15 = vld [vmem:[%s1315_s30 + $0x4] ss:$8 sm:$0x3] }
  0x4a   : > { %vm1467_vm0 = vcmp.eq.s32.totalorder %v1325_v1, %v502_v3  ;;  %v518_v30 = vsel %vm507_vm15, %v512_v20, %v499_v21  ;;  %vm522_vm1 = vmor %vm1439_vm11, %vm507_vm15  ;;  %v477_v31 = vsel %vm466_vm13, %v473_v62, %v458_v26  ;;  %vm448_vm2 = vcmp.eq.s32.totalorder %v1325_v1, %v446_v6  ;;  %v1590_v28 = vld [vmem:[%s1315_s30 + $0x14] ss:$8 sm:$0x3] }
  0x4b   : > { %v515_v32 = vsel %vm1467_vm0, %v511_v4, %v496_v27  ;;  %v526_v35 = vsel %vm522_vm1, %v518_v30, %v480_v17  ;;  %vm519_vm3 = vmor %vm1450_vm14, %vm1467_vm0  ;;  %v459_v36 = vsel %vm448_vm2, %v455_v7, 0.0  ;;  %vm467_vm4 = vcmp.eq.s32.totalorder %v1325_v1, %v465_v10  ;;  %v1546_v10 = vld [vmem:[%s1315_s30] ss:$8 sm:$0x3]  ;;  %v614_v8 = vld [vmem:[#allocation7 + $0x18] sm:$0xff] }
  0x4c   : > { %vm1491_vm5 = vcmp.eq.s32.totalorder %v1325_v1, %v484_v13  ;;  %906 = vmatpush.msra.mxu3 %v526_v35  ;;  %v523_v39 = vsel %vm519_vm3, %v515_v32, %v477_v31  ;;  %v478_v40 = vsel %vm467_vm4, %v474_v12, %v459_v36  ;;  %vm505_vm6 = vcmp.eq.s32.totalorder %v1325_v1, %v503_v19  ;;  %v1568_v19 = vld [vmem:[%s1308_s11 + $0x10] ss:$8 sm:$0x3] }
  0x4d   : > { %v497_v41 = vsel %vm1491_vm5, %v493_v16, 0.0  ;;  %667 = vmatpush.msra.mxu1 %v526_v35  ;;  %899 = vmatpush.msra.mxu2 %v523_v39  ;;  %vm520_vm7 = vmor %vm1491_vm5, %vm505_vm6  ;;  %v361_v44 = vperm.slane %v1455_v23, 0  ;;  %v370_v45 = vperm.slane %v1458_v24, 0  ;;  %v380_v46 = vperm.slane %v1461_v25, 0 }
  0x4e   : > { %v516_v43 = vsel %vm505_vm6, %v512_v20, %v497_v41  ;;  %639 = vmatpush.msra.mxu0 %v523_v39  ;;  %v389_v48 = vperm.slane %v1472_v29, 0  ;;  %v399_v49 = vperm.slane %v1480_v33, 0  ;;  %v408_v50 = vperm.slane %v1483_v34, 0  ;;  %v1571_v20 = vld [vmem:[%s1315_s30 + $0x10] ss:$8 sm:$0x3] }
  0x4f   : > { %v524_v47 = vsel %vm520_vm7, %v516_v43, %v478_v40  ;;  %vm365_vm8 = vcmp.eq.s32.totalorder %v1328_v2, %v361_v44  ;;  %vm384_vm9 = vcmp.eq.s32.totalorder %v1328_v2, %v380_v46  ;;  %v418_v51 = vperm.slane %v1496_v38, 0 }
  0x50   : > { %907 = vmatpush.msra.mxu3 %v524_v47  ;;  %v427_v52 = vperm.slane %v1502_v42, 0  ;;  %668 = vmatpush.msra.mxu1 %v524_v47  ;;  %v376_v53 = vsel %vm365_vm8, %v370_v45, 0.0  ;;  %vm403_vm10 = vcmp.eq.s32.totalorder %v1328_v2, %v399_v49  ;;  %v362_v54 = vperm.slane %v1455_v23, 1 }
  0x51   : > { %v371_v55 = vperm.slane %v1458_v24, 1  ;;  %v395_v56 = vsel %vm384_vm9, %v389_v48, %v376_v53  ;;  %v414_v57 = vsel %vm403_vm10, %v408_v50, 0.0  ;;  %vm422_vm11 = vcmp.eq.s32.totalorder %v1328_v2, %v418_v51  ;;  %v1584_v24 = vld [vmem:[%s1308_s11 + $0x14] ss:$8 sm:$0x3] }
  0x52   : > { %v381_v58 = vperm.slane %v1461_v25, 1  ;;  %v433_v59 = vsel %vm422_vm11, %v427_v52, %v414_v57  ;;  %vm437_vm12 = vmor %vm403_vm10, %vm422_vm11  ;;  %vm366_vm13 = vcmp.eq.s32.totalorder %v1328_v2, %v362_v54  ;;  %v390_v60 = vperm.slane %v1472_v29, 1 }
  0x53   : > { %v400_v61 = vperm.slane %v1480_v33, 1  ;;  %v441_v62 = vsel %vm437_vm12, %v433_v59, %v395_v56  ;;  %v377_v63 = vsel %vm366_vm13, %v371_v55, 0.0  ;;  %v409_v0 = vperm.slane %v1483_v34, 1 }
  0x54   : > { %vm385_vm14 = vcmp.eq.s32.totalorder %v1328_v2, %v381_v58  ;;  %900 = vmatpush.msra.mxu2 %v441_v62  ;;  %v419_v5 = vperm.slane %v1496_v38, 1  ;;  %v428_v6 = vperm.slane %v1502_v42, 1  ;;  %640 = vmatpush.msra.mxu0 %v441_v62  ;;  %vm363_vm0 = vcmp.eq.s32.totalorder %v1325_v1, %v361_v44 }
  0x55   : > { %v396_v3 = vsel %vm385_vm14, %v390_v60, %v377_v63  ;;  %vm1527_vm15 = vcmp.eq.s32.totalorder %v1328_v2, %v400_v61  ;;  %vm382_vm1 = vcmp.eq.s32.totalorder %v1325_v1, %v380_v46  ;;  %vm1538_vm2 = vcmp.eq.s32.totalorder %v1325_v1, %v399_v49 }
  0x56   : > { %v415_v7 = vsel %vm1527_vm15, %v409_v0, 0.0  ;;  %vm423_vm3 = vcmp.eq.s32.totalorder %v1328_v2, %v419_v5  ;;  %v374_v12 = vsel %vm363_vm0, %v370_v45, 0.0  ;;  %v412_v13 = vsel %vm1538_vm2, %v408_v50, 0.0 }
  0x57   : > { %vm1555_vm4 = vcmp.eq.s32.totalorder %v1325_v1, %v418_v51  ;;  %v434_v16 = vsel %vm423_vm3, %v428_v6, %v415_v7  ;;  %vm438_vm5 = vmor %vm1527_vm15, %vm423_vm3  ;;  %v393_v17 = vsel %vm382_vm1, %v389_v48, %v374_v12  ;;  %vm364_vm6 = vcmp.eq.s32.totalorder %v1325_v1, %v362_v54 }
  0x58   : > { %v431_v18 = vsel %vm1555_vm4, %v427_v52, %v412_v13  ;;  %v442_v21 = vsel %vm438_vm5, %v434_v16, %v396_v3  ;;  %vm435_vm7 = vmor %vm1538_vm2, %vm1555_vm4  ;;  %v375_v22 = vsel %vm364_vm6, %v371_v55, 0.0  ;;  %vm383_vm8 = vcmp.eq.s32.totalorder %v1325_v1, %v381_v58 }
  0x59   : > { %vm1579_vm9 = vcmp.eq.s32.totalorder %v1325_v1, %v400_v61  ;;  %908 = vmatpush.msra.mxu3 %v442_v21  ;;  %v439_v25 = vsel %vm435_vm7, %v431_v18, %v393_v17  ;;  %v394_v26 = vsel %vm383_vm8, %v390_v60, %v375_v22  ;;  %vm421_vm10 = vcmp.eq.s32.totalorder %v1325_v1, %v419_v5 }
  0x5a   : > { %v413_v27 = vsel %vm1579_vm9, %v409_v0, 0.0  ;;  %669 = vmatpush.msra.mxu1 %v442_v21  ;;  %901 = vmatpush.msra.mxu2 %v439_v25  ;;  %vm436_vm11 = vmor %vm1579_vm9, %vm421_vm10  ;;  %v278_v30 = vperm.slane %v1543_v9, 0  ;;  %v286_v31 = vperm.slane %v1546_v10, 0  ;;  %v296_v32 = vperm.slane %v1549_v11, 0  ;;  %v611_v0 = vld [vmem:[#allocation7] sm:$0xff] }
  0x5b   : > { %v432_v29 = vsel %vm421_vm10, %v428_v6, %v413_v27  ;;  %641 = vmatpush.msra.mxu0 %v439_v25  ;;  %v305_v34 = vperm.slane %v1560_v15, 0  ;;  %v315_v35 = vperm.slane %v1568_v19, 0  ;;  %v324_v36 = vperm.slane %v1571_v20, 0 }
  0x5c   : > { %v440_v33 = vsel %vm436_vm11, %v432_v29, %v394_v26  ;;  %vm282_vm12 = vcmp.eq.s32.totalorder %v1328_v2, %v278_v30  ;;  %vm300_vm13 = vcmp.eq.s32.totalorder %v1328_v2, %v296_v32  ;;  %v334_v37 = vperm.slane %v1584_v24, 0 }
  0x5d   : > { %909 = vmatpush.msra.mxu3 %v440_v33  ;;  %v343_v38 = vperm.slane %v1590_v28, 0  ;;  %670 = vmatpush.msra.mxu1 %v440_v33  ;;  %v292_v39 = vsel %vm282_vm12, %v286_v31, 0.0  ;;  %vm319_vm14 = vcmp.eq.s32.totalorder %v1328_v2, %v315_v35  ;;  %v279_v40 = vperm.slane %v1543_v9, 1  ;;  %v612_v9 = vld [vmem:[#allocation7 + $0x8] sm:$0xff] }
  0x5e   : > { %v287_v41 = vperm.slane %v1546_v10, 1  ;;  %v311_v42 = vsel %vm300_vm13, %v305_v34, %v292_v39  ;;  %v330_v43 = vsel %vm319_vm14, %v324_v36, 0.0  ;;  %vm338_vm15 = vcmp.eq.s32.totalorder %v1328_v2, %v334_v37 }
  0x5f   : > { %v297_v44 = vperm.slane %v1549_v11, 1  ;;  %v349_v45 = vsel %vm338_vm15, %v343_v38, %v330_v43  ;;  %vm353_vm0 = vmor %vm319_vm14, %vm338_vm15  ;;  %vm283_vm1 = vcmp.eq.s32.totalorder %v1328_v2, %v279_v40  ;;  %v306_v46 = vperm.slane %v1560_v15, 1 }
  0x60   : > { %v316_v47 = vperm.slane %v1568_v19, 1  ;;  %v357_v48 = vsel %vm353_vm0, %v349_v45, %v311_v42  ;;  %v293_v49 = vsel %vm283_vm1, %v287_v41, 0.0  ;;  %v325_v50 = vperm.slane %v1571_v20, 1 }
  0x61   : > { %vm301_vm2 = vcmp.eq.s32.totalorder %v1328_v2, %v297_v44  ;;  %902 = vmatpush.msra.mxu2 %v357_v48  ;;  %v335_v53 = vperm.slane %v1584_v24, 1  ;;  %v344_v54 = vperm.slane %v1590_v28, 1  ;;  %642 = vmatpush.msra.mxu0 %v357_v48  ;;  %vm280_vm4 = vcmp.eq.s32.totalorder %v1325_v1, %v278_v30 }
  0x62   : > { %v312_v51 = vsel %vm301_vm2, %v306_v46, %v293_v49  ;;  %vm1615_vm3 = vcmp.eq.s32.totalorder %v1328_v2, %v316_v47  ;;  %vm298_vm5 = vcmp.eq.s32.totalorder %v1325_v1, %v296_v32  ;;  %vm1626_vm6 = vcmp.eq.s32.totalorder %v1325_v1, %v315_v35 }
  0x63   : > { %v331_v55 = vsel %vm1615_vm3, %v325_v50, 0.0  ;;  %vm339_vm7 = vcmp.eq.s32.totalorder %v1328_v2, %v335_v53  ;;  %v290_v57 = vsel %vm280_vm4, %v286_v31, 0.0  ;;  %v328_v58 = vsel %vm1626_vm6, %v324_v36, 0.0  ;;  %v613_v2 = vld [vmem:[#allocation7 + $0x10] sm:$0xff] }
  0x64   : > { %vm336_vm8 = vcmp.eq.s32.totalorder %v1325_v1, %v334_v37  ;;  %v350_v59 = vsel %vm339_vm7, %v344_v54, %v331_v55  ;;  %vm354_vm9 = vmor %vm1615_vm3, %vm339_vm7  ;;  %v309_v60 = vsel %vm298_vm5, %v305_v34, %v290_v57  ;;  %vm281_vm10 = vcmp.eq.s32.totalorder %v1325_v1, %v279_v40 }
  0x65   : > { %v347_v61 = vsel %vm336_vm8, %v343_v38, %v328_v58  ;;  %v358_v62 = vsel %vm354_vm9, %v350_v59, %v312_v51  ;;  %vm351_vm11 = vmor %vm1626_vm6, %vm336_vm8  ;;  %v291_v63 = vsel %vm281_vm10, %v287_v41, 0.0  ;;  %vm299_vm12 = vcmp.eq.s32.totalorder %v1325_v1, %v297_v44 }
  0x66   : > { %vm318_vm13 = vcmp.eq.s32.totalorder %v1325_v1, %v316_v47  ;;  %910 = vmatpush.msra.mxu3 %v358_v62  ;;  %v355_v3 = vsel %vm351_vm11, %v347_v61, %v309_v60  ;;  %v310_v4 = vsel %vm299_vm12, %v306_v46, %v291_v63  ;;  %vm337_vm14 = vcmp.eq.s32.totalorder %v1325_v1, %v335_v53 }
  0x67   : > { %v329_v5 = vsel %vm318_vm13, %v325_v50, 0.0  ;;  %671 = vmatpush.msra.mxu1 %v358_v62  ;;  %903 = vmatpush.msra.mxu2 %v355_v3  ;;  %vm352_vm15 = vmor %vm318_vm13, %vm337_vm14  ;;  %vm615_vm0 = vcmask 523264  }
  0x68   : > { %v348_v6 = vsel %vm337_vm14, %v344_v54, %v329_v5  ;;  %643 = vmatpush.msra.mxu0 %v355_v3  ;;  %882 = vmatmul.msk.f32.vlgmr.msra.gmra.mxu2 %vm615_vm0, %v613_v2 }
  0x69   : > { %v356_v7 = vsel %vm352_vm15, %v348_v6, %v310_v4  ;;  %880 = vmatmul.msk.f32.vlgmr.msra.gmra.mxu0 %vm615_vm0, %v611_v0 }
  0x6a   : > { %911 = vmatpush.msra.mxu3 %v356_v7  ;;  %672 = vmatpush.msra.mxu1 %v356_v7 }
  0x6b   : > { %886 = vmatmul.msk.f32.vlgmr.msra.gmra.mxu3 %vm615_vm0, %v613_v2  ;;  %884 = vmatmul.msk.f32.vlgmr.msra.gmra.mxu1 %vm615_vm0, %v611_v0 }
  0x70   : > { %883 = vmatmul.msk.f32.gmra.mxu2 %vm615_vm0, %v614_v8 }
  0x71   : > { %881 = vmatmul.msk.f32.gmra.mxu0 %vm615_vm0, %v612_v9 }
  0x73   : > { %887 = vmatmul.msk.f32.gmra.mxu3 %vm615_vm0, %v614_v8  ;;  %885 = vmatmul.msk.f32.gmra.mxu1 %vm615_vm0, %v612_v9 }
  0xe6   : > { %v645_v1 = vpop.f32.mrf.mxu0 }
  0xe7   : > { %686 = vst [vmem:[%s270_s20] sm:$0xff] %v645_v1 }
  0xe8   : > { %v674_v10 = vpop.f32.mrf.mxu1 }
  0xe9   : > { %687 = vst [vmem:[%s270_s20 + $0x8] sm:$0xff] %v674_v10 }
  0xeb   : > { %v651_v11 = vpop.f32.mrf.mxu2 }
  0xec   : > { %690 = vst [vmem:[%s270_s20 + $0x20] sm:$0xff] %v651_v11 }
  0xee   : > { %v680_v12 = vpop.f32.mrf.mxu3  ;;  %v648_v13 = vpop.f32.mrf.mxu0 }
  0xef   : > { %691 = vst [vmem:[%s270_s20 + $0x28] sm:$0xff] %v680_v12 }
  0xf0   : > { %688 = vst [vmem:[%s270_s20 + $0x10] sm:$0xff] %v648_v13  ;;  %v677_v14 = vpop.f32.mrf.mxu1 }
  0xf1   : > { %689 = vst [vmem:[%s270_s20 + $0x18] sm:$0xff] %v677_v14 }
  0xf3   : > { %v654_v15 = vpop.f32.mrf.mxu2 }
  0xf4   : > { %692 = vst [vmem:[%s270_s20 + $0x30] sm:$0xff] %v654_v15 }
  0xf6   : > { %v683_v16 = vpop.f32.mrf.mxu3 }
  0xf7   : > { %693 = vst [vmem:[%s270_s20 + $0x38] sm:$0xff] %v683_v16 }
  0xf8   : > { %1113 = shalt.err (!%p1110_p0)
}
  0xf9   : > { %s1183_s5 = smov 256   ;;  %s1184_s2 = smov 16  }
  0xfa   : > { %920 = dma.vmem_to_hbm [thread:$0]  (%p1280_p5), %s710_s27, 1024, %s712_s28, %s695_s15, %s1183_s5, %s1183_s5, %s1184_s2  }
  0xfb PF: > { %s726_s11 = sand.u32 1, %s1156_s12   ;;  %p934_p3 = pnand %p838_p11, %p1250_p6 }
  0xfc   : > { %s727_s16 = scalar_lea.sflag [#allocation4], %s726_s11 }
  0xfd   : > { %p935_p7 = pneg %p934_p3 }
  0xff   : > { %1151 = dma.done.wait (%p935_p7), %s727_s16, 1024  }
 0x100   : > { %1153 = vsyncadd (%p935_p7), %s727_s16, 4294966272  ;;  %s22_s17 = sadd.s32 1, %s1176_s17   ;;  %s1725_s25 = sld [smem:[#allocation15_spill]] }
 0x101   : > { %p19_p9 = scmp.ge.s32.totalorder %s22_s17, 4   ;;  %s1726_s15 = sld [smem:[#allocation13_spill]] }
 0x102   : > { %s1727_s16 = sld [smem:[#allocation14_spill]]  ;;  %s1728_s12 = smov %s1160_s13 }
 0x103   : > { %s1729_s13 = smov %s1164_s14  ;;  %21 = sbr.rel (!%p19_p9) target bundleno = 10 (0xa), region = 124 }
 0x106   : > { %s1730_s14 = smov %s1725_s25 }
 0x108   :  { %733 = vsyncpa [#allocation3], 1 }
 0x109   :  { %735 = vsyncpa [#allocation3 + $0x1], 1 }
 0x10a   :  { %736 = vsyncpa [#allocation6], 1 }
 0x10b   :  { %738 = vsyncpa [#allocation6 + $0x1], 1 }
 0x10c   :  { %739 = vsyncpa [#allocation4], 1 }
 0x10d   :  { %741 = vsyncpa [#allocation4 + $0x1], 1 }

</bundles_post_ra>
